<compile_context>
chip_gen: v7x
topology: tpu7x:2x2x1
jax: 0.10.0
libtpu: 0.0.40
codegen_flags: <defaults>
</compile_context>

<pallas_src>
import numpy as np
import jax
import jax.numpy as jnp
from jax.experimental import pallas as pl
from jax.experimental.pallas import tpu as pltpu


def _actor_critic_kernel(s_ref, img_ref,
                         wsp_ref, wip_ref, bp_ref,
                         wsv_ref, wiv_ref, bv_ref,
                         pi_ref, vf_ref):
    """Fused (concat -> Linear -> ReLU) for the policy and value heads."""
    s = s_ref[...]
    img = img_ref[...]

    pi = jnp.dot(s, wsp_ref[...], preferred_element_type=jnp.float32)
    pi = pi + jnp.dot(img, wip_ref[...], preferred_element_type=jnp.float32)
    pi = pi + bp_ref[...]
    pi_ref[...] = jnp.maximum(pi, 0.0).astype(pi_ref.dtype)

    vf = jnp.dot(s, wsv_ref[...], preferred_element_type=jnp.float32)
    vf = vf + jnp.dot(img, wiv_ref[...], preferred_element_type=jnp.float32)
    vf = vf + bv_ref[...]
    vf_ref[...] = jnp.maximum(vf, 0.0).astype(vf_ref.dtype)


def fused_actor_critic(state, image_features,
                       w_state_pi, w_img_pi, b_pi,
                       w_state_vf, w_img_vf, b_vf):
    B, S = state.shape
    _, I = image_features.shape
    E = w_state_pi.shape[1]

    # Batch tile: full batch for small B; otherwise a sublane-aligned tile so
    # the pipeline double-buffers and (on v7x) the copy/compute is sharded
    # across both TensorCores. Weights stay resident (constant block index).
    if B > 256 and B % 256 == 0:
        block_b = 256
    else:
        block_b = B
    grid = (B // block_b,)

    def row_spec(last):
        return pl.BlockSpec((block_b, last), lambda i: (i, 0))

    def fixed_spec(shape):
        return pl.BlockSpec(shape, lambda i: (0, 0))

    out_shape = (jax.ShapeDtypeStruct((B, E), state.dtype),
                 jax.ShapeDtypeStruct((B, E), state.dtype))

    return pl.pallas_call(
        _actor_critic_kernel,
        out_shape=out_shape,
        grid=grid,
        in_specs=[
            row_spec(S),            # state
            row_spec(I),            # image_features
            fixed_spec((S, E)),     # policy: folded state weights
            fixed_spec((I, E)),     # policy: image-feature weights
            fixed_spec((1, E)),     # policy: bias
            fixed_spec((S, E)),     # value: folded state weights
            fixed_spec((I, E)),     # value: image-feature weights
            fixed_spec((1, E)),     # value: bias
        ],
        out_specs=(row_spec(E), row_spec(E)),
        compiler_params=pltpu.CompilerParams(
            dimension_semantics=("parallel",)),
    )(state, image_features,
      w_state_pi, w_img_pi, b_pi,
      w_state_vf, w_img_vf, b_vf)


class _DenseHead:
    """One Actor/Critic head: parameters for Linear(3*S + I -> E) + ReLU."""

    def __init__(self, key, state_feat_dim, image_feat_dim, emb_size,
                 dtype=jnp.float32):
        in_dim = 3 * state_feat_dim + image_feat_dim
        kw, kb = jax.random.split(key)
        bound = 1.0 / float(np.sqrt(in_dim))
        # Stored as (in, out) so the kernel contracts over rows.
        w = jax.random.uniform(kw, (in_dim, emb_size), dtype, -bound, bound)
        b = jax.random.uniform(kb, (emb_size,), dtype, -bound, bound)
        S = state_feat_dim
        # Fold the three replicated `state` weight blocks once at init time.
        self.w_state_eff = w[:S] + w[S:2 * S] + w[2 * S:3 * S]
        self.w_img = w[3 * S:]
        self.bias = b.reshape(1, emb_size)
        # Kept only for the pure-JAX reference check in __main__.
        self.w_full = w
        self.b_full = b


class CustomNetwork:
    """Pallas mirror of the PyTorch CustomNetwork: returns (latent_pi, latent_vf).

    The original PyTorch code constructs Actor()/Critic() with no arguments and
    passes a single `features` tensor to a two-argument forward; here the
    constructor takes explicit dims and forward takes (image_features, state),
    which is what Actor/Critic.forward actually consumes.
    """
    # TODO(synk): the Conv2d(128,16,1)+ReLU branch in Actor/Critic is dead code
    # in the reference forward (never invoked), so it is not implemented.

    def __init__(self, state_feat_dim, image_feat_dim, emb_size, key=None):
        key = jax.random.PRNGKey(0) if key is None else key
        k_pi, k_vf = jax.random.split(key)
        self.latent_dim_pi = emb_size
        self.latent_dim_vf = emb_size
        self.policy_net = _DenseHead(k_pi, state_feat_dim, image_feat_dim, emb_size)
        self.value_net = _DenseHead(k_vf, state_feat_dim, image_feat_dim, emb_size)

    def __call__(self, image_features, state):
        p, v = self.policy_net, self.value_net
        return fused_actor_critic(
            state, image_features,
            p.w_state_eff, p.w_img, p.bias,
            v.w_state_eff, v.w_img, v.bias)

    def forward_actor(self, image_features, state):
        return self(image_features, state)[0]

    def forward_critic(self, image_features, state):
        return self(image_features, state)[1]


if __name__ == "__main__":
    key = jax.random.PRNGKey(0)
    k_net, k_state, k_img = jax.random.split(key, 3)

    B = 2
    STATE_FEAT = 8      # per-copy state dim (replicated 3x by the forward)
    IMG_FEAT = 104      # image-feature dim -> concat width 3*8 + 104 = 128
    EMB = 128           # lane-dense output width

    state = jax.random.normal(k_state, (B, STATE_FEAT), jnp.float32)
    image_features = jax.random.normal(k_img, (B, IMG_FEAT), jnp.float32)

    net = CustomNetwork(STATE_FEAT, IMG_FEAT, EMB, key=k_net)
    latent_pi, latent_vf = net(image_features, state)
    latent_pi = jax.block_until_ready(latent_pi)
    latent_vf = jax.block_until_ready(latent_vf)

    # Pure-JAX reference matching the PyTorch forward exactly.
    def ref_head(head):
        x = jnp.concatenate([state, state, state, image_features], axis=-1)
        return jnp.maximum(x @ head.w_full + head.b_full, 0.0)

    assert latent_pi.shape == (B, EMB) and latent_vf.shape == (B, EMB)
    np.testing.assert_allclose(np.asarray(latent_pi),
                               np.asarray(ref_head(net.policy_net)),
                               rtol=1e-4, atol=1e-4)
    np.testing.assert_allclose(np.asarray(latent_vf),
                               np.asarray(ref_head(net.value_net)),
                               rtol=1e-4, atol=1e-4)

    print("KERNEL_OK")
</pallas_src>

<mosaic_0001>
module attributes {stable_mosaic.version = 11 : i64} {
  func.func @_actor_critic_kernel(%arg0: i32, %arg1: memref<2x8xf32, #tpu.memory_space<vmem>>, %arg2: memref<2x104xf32, #tpu.memory_space<vmem>>, %arg3: memref<8x128xf32, #tpu.memory_space<vmem>>, %arg4: memref<104x128xf32, #tpu.memory_space<vmem>>, %arg5: memref<1x128xf32, #tpu.memory_space<vmem>>, %arg6: memref<8x128xf32, #tpu.memory_space<vmem>>, %arg7: memref<104x128xf32, #tpu.memory_space<vmem>>, %arg8: memref<1x128xf32, #tpu.memory_space<vmem>>, %arg9: memref<2x128xf32, #tpu.memory_space<vmem>>, %arg10: memref<2x128xf32, #tpu.memory_space<vmem>>) attributes {dimension_semantics = [#tpu.dimension_semantics<parallel>], iteration_bounds = array<i64: 1>, scalar_prefetch = 0 : i64, scratch_operands = 0 : i64, tpu.core_type = #tpu.core_type<tc>, window_params = [{transform_indices = @transform_0, window_bounds = array<i64: 2, 8>}, {transform_indices = @transform_1, window_bounds = array<i64: 2, 104>}, {pipeline_mode = #tpu.pipeline_mode<synchronous>, transform_indices = @transform_2, window_bounds = array<i64: 8, 128>}, {pipeline_mode = #tpu.pipeline_mode<synchronous>, transform_indices = @transform_3, window_bounds = array<i64: 104, 128>}, {pipeline_mode = #tpu.pipeline_mode<synchronous>, transform_indices = @transform_4, window_bounds = array<i64: 1, 128>}, {pipeline_mode = #tpu.pipeline_mode<synchronous>, transform_indices = @transform_5, window_bounds = array<i64: 8, 128>}, {pipeline_mode = #tpu.pipeline_mode<synchronous>, transform_indices = @transform_6, window_bounds = array<i64: 104, 128>}, {pipeline_mode = #tpu.pipeline_mode<synchronous>, transform_indices = @transform_7, window_bounds = array<i64: 1, 128>}, {transform_indices = @transform_8, window_bounds = array<i64: 2, 128>}, {transform_indices = @transform_9, window_bounds = array<i64: 2, 128>}]} {
    %c0 = arith.constant 0 : index
    %c0_0 = arith.constant 0 : index
    %0 = vector.load %arg1[%c0, %c0_0] : memref<2x8xf32, #tpu.memory_space<vmem>>, vector<2x8xf32>
    %c0_1 = arith.constant 0 : index
    %c0_2 = arith.constant 0 : index
    %1 = vector.load %arg2[%c0_1, %c0_2] : memref<2x104xf32, #tpu.memory_space<vmem>>, vector<2x104xf32>
    %c0_3 = arith.constant 0 : index
    %c0_4 = arith.constant 0 : index
    %2 = vector.load %arg3[%c0_3, %c0_4] : memref<8x128xf32, #tpu.memory_space<vmem>>, vector<8x128xf32>
    %cst = arith.constant dense<0.000000e+00> : vector<2x128xf32>
    %3 = tpu.matmul %0, %2, %cst {dimension_numbers = #tpu.dot_dimension_numbers<[1], [0], [0], [1], [0, 0, 1, 1], [], []>} : vector<2x8xf32>, vector<8x128xf32>, vector<2x128xf32> -> vector<2x128xf32>
    %c0_5 = arith.constant 0 : index
    %c0_6 = arith.constant 0 : index
    %4 = vector.load %arg4[%c0_5, %c0_6] : memref<104x128xf32, #tpu.memory_space<vmem>>, vector<104x128xf32>
    %cst_7 = arith.constant dense<0.000000e+00> : vector<2x128xf32>
    %5 = tpu.matmul %1, %4, %cst_7 {dimension_numbers = #tpu.dot_dimension_numbers<[1], [0], [0], [1], [0, 0, 1, 1], [], []>} : vector<2x104xf32>, vector<104x128xf32>, vector<2x128xf32> -> vector<2x128xf32>
    %6 = arith.addf %3, %5 : vector<2x128xf32>
    %c0_8 = arith.constant 0 : index
    %c0_9 = arith.constant 0 : index
    %7 = vector.load %arg5[%c0_8, %c0_9] : memref<1x128xf32, #tpu.memory_space<vmem>>, vector<1x128xf32>
    %8 = vector.broadcast %7 : vector<1x128xf32> to vector<2x128xf32>
    %9 = arith.addf %6, %8 : vector<2x128xf32>
    %cst_10 = arith.constant 0.000000e+00 : f32
    %10 = vector.broadcast %cst_10 : f32 to vector<2x128xf32>
    %11 = arith.maximumf %9, %10 : vector<2x128xf32>
    %c0_11 = arith.constant 0 : index
    %c0_12 = arith.constant 0 : index
    %12 = vector.load %arg9[%c0_11, %c0_12] : memref<2x128xf32, #tpu.memory_space<vmem>>, vector<2x128xf32>
    tpu.vector_store %arg9[%c0_11, %c0_12], %11 {strides = array<i32>} : memref<2x128xf32, #tpu.memory_space<vmem>>, vector<2x128xf32>,
    %c0_13 = arith.constant 0 : index
    %c0_14 = arith.constant 0 : index
    %13 = vector.load %arg6[%c0_13, %c0_14] : memref<8x128xf32, #tpu.memory_space<vmem>>, vector<8x128xf32>
    %cst_15 = arith.constant dense<0.000000e+00> : vector<2x128xf32>
    %14 = tpu.matmul %0, %13, %cst_15 {dimension_numbers = #tpu.dot_dimension_numbers<[1], [0], [0], [1], [0, 0, 1, 1], [], []>} : vector<2x8xf32>, vector<8x128xf32>, vector<2x128xf32> -> vector<2x128xf32>
    %c0_16 = arith.constant 0 : index
    %c0_17 = arith.constant 0 : index
    %15 = vector.load %arg7[%c0_16, %c0_17] : memref<104x128xf32, #tpu.memory_space<vmem>>, vector<104x128xf32>
    %cst_18 = arith.constant dense<0.000000e+00> : vector<2x128xf32>
    %16 = tpu.matmul %1, %15, %cst_18 {dimension_numbers = #tpu.dot_dimension_numbers<[1], [0], [0], [1], [0, 0, 1, 1], [], []>} : vector<2x104xf32>, vector<104x128xf32>, vector<2x128xf32> -> vector<2x128xf32>
    %17 = arith.addf %14, %16 : vector<2x128xf32>
    %c0_19 = arith.constant 0 : index
    %c0_20 = arith.constant 0 : index
    %18 = vector.load %arg8[%c0_19, %c0_20] : memref<1x128xf32, #tpu.memory_space<vmem>>, vector<1x128xf32>
    %19 = vector.broadcast %18 : vector<1x128xf32> to vector<2x128xf32>
    %20 = arith.addf %17, %19 : vector<2x128xf32>
    %cst_21 = arith.constant 0.000000e+00 : f32
    %21 = vector.broadcast %cst_21 : f32 to vector<2x128xf32>
    %22 = arith.maximumf %20, %21 : vector<2x128xf32>
    %c0_22 = arith.constant 0 : index
    %c0_23 = arith.constant 0 : index
    %23 = vector.load %arg10[%c0_22, %c0_23] : memref<2x128xf32, #tpu.memory_space<vmem>>, vector<2x128xf32>
    tpu.vector_store %arg10[%c0_22, %c0_23], %22 {strides = array<i32>} : memref<2x128xf32, #tpu.memory_space<vmem>>, vector<2x128xf32>,
    return
  }
  func.func @transform_0(%arg0: i32) -> (i32, i32) {
    %c0_i32 = arith.constant 0 : i32
    %c0_i32_0 = arith.constant 0 : i32
    return %arg0, %c0_i32 : i32, i32
  }
  func.func @transform_1(%arg0: i32) -> (i32, i32) {
    %c0_i32 = arith.constant 0 : i32
    %c0_i32_0 = arith.constant 0 : i32
    return %arg0, %c0_i32 : i32, i32
  }
  func.func @transform_2(%arg0: i32) -> (i32, i32) {
    %c0_i32 = arith.constant 0 : i32
    %c0_i32_0 = arith.constant 0 : i32
    %c0_i32_1 = arith.constant 0 : i32
    return %c0_i32, %c0_i32_0 : i32, i32
  }
  func.func @transform_3(%arg0: i32) -> (i32, i32) {
    %c0_i32 = arith.constant 0 : i32
    %c0_i32_0 = arith.constant 0 : i32
    %c0_i32_1 = arith.constant 0 : i32
    return %c0_i32, %c0_i32_0 : i32, i32
  }
  func.func @transform_4(%arg0: i32) -> (i32, i32) {
    %c0_i32 = arith.constant 0 : i32
    %c0_i32_0 = arith.constant 0 : i32
    %c0_i32_1 = arith.constant 0 : i32
    return %c0_i32, %c0_i32_0 : i32, i32
  }
  func.func @transform_5(%arg0: i32) -> (i32, i32) {
    %c0_i32 = arith.constant 0 : i32
    %c0_i32_0 = arith.constant 0 : i32
    %c0_i32_1 = arith.constant 0 : i32
    return %c0_i32, %c0_i32_0 : i32, i32
  }
  func.func @transform_6(%arg0: i32) -> (i32, i32) {
    %c0_i32 = arith.constant 0 : i32
    %c0_i32_0 = arith.constant 0 : i32
    %c0_i32_1 = arith.constant 0 : i32
    return %c0_i32, %c0_i32_0 : i32, i32
  }
  func.func @transform_7(%arg0: i32) -> (i32, i32) {
    %c0_i32 = arith.constant 0 : i32
    %c0_i32_0 = arith.constant 0 : i32
    %c0_i32_1 = arith.constant 0 : i32
    return %c0_i32, %c0_i32_0 : i32, i32
  }
  func.func @transform_8(%arg0: i32) -> (i32, i32) {
    %c0_i32 = arith.constant 0 : i32
    %c0_i32_0 = arith.constant 0 : i32
    return %arg0, %c0_i32 : i32, i32
  }
  func.func @transform_9(%arg0: i32) -> (i32, i32) {
    %c0_i32 = arith.constant 0 : i32
    %c0_i32_0 = arith.constant 0 : i32
    return %arg0, %c0_i32 : i32, i32
  }
}

</mosaic_0001>

<bundles_post_ra>
// kernel: tpu_custom_call.1
= control target key start
LH: loop header
LB: loop body
LE: loop exit
PB: predicated region body
PF: predicated region fallthrough
CT: control target
= control target key end

     0   :  { %15 = vsyncpa [#allocation3], 0  ;;  %s923_s0 = inlined_call_operand.hbm [shape: f32[2,8], index: 0, kind: input, shape index: {}]   ;;  %s924_s1 = inlined_call_operand.vmem [shape: f32[2,104], index: 1, kind: input, shape index: {}]   ;;  %s925_s2 = inlined_call_operand.hbm [shape: f32[8,128], index: 2, kind: input, shape index: {}]   ;;  %s926_s3 = inlined_call_operand.hbm [shape: f32[104,128], index: 3, kind: input, shape index: {}]   ;;  %s927_s4 = inlined_call_operand.vmem [shape: f32[1,128], index: 4, kind: input, shape index: {}]   ;;  %s928_s5 = inlined_call_operand.vmem [shape: f32[8,128], index: 5, kind: input, shape index: {}]   ;;  %s929_s6 = inlined_call_operand.hbm [shape: f32[104,128], index: 6, kind: input, shape index: {}]   ;;  %s930_s7 = inlined_call_operand.vmem [shape: f32[1,128], index: 7, kind: input, shape index: {}]   ;;  %s931_s8 = inlined_call_operand.hbm [shape: f32[2,128], index: 8, kind: output, shape index: {0}]   ;;  %s932_s9 = inlined_call_operand.hbm [shape: f32[2,128], index: 9, kind: output, shape index: {1}]  }
   0x1   :  { %16 = vsyncpa [#allocation6], 0 }
   0x2   :  { %17 = vsyncpa [#allocation9], 0 }
   0x3   :  { %18 = vsyncpa [#allocation4], 0 }
   0x4   :  { %19 = vsyncpa [#allocation12], 0  ;;  %s748_s30 = smov [#allocation5]   ;;  %s749_s11 = smov [#allocation2]  }
   0x5   :  { %s38_s10 = sshll.u32 %s748_s30, 4  ;;  %s26_s12 = sshll.u32 %s749_s11, 4  ;;  %s39_s10 = int_to_ptr.vmem [resolvable:$true] %s38_s10  ;;  %s27_s12 = int_to_ptr.vmem [resolvable:$true] %s26_s12 }
   0x6   :  { %s606_s15 = scalar_lea.hbm %s925_s2, 128 }
   0x7   :  { %p607_p0 = scmp.ne.s32.totalorder %s925_s2, %s606_s15  ;;  %p610_p1 = scmp.lt.u32.totalorder %s606_s15, %s925_s2 }
   0x9   :  { %p612_p2 = pnand %p610_p1, %p607_p0 }
   0xb   :  { %615 = shalt.err (!%p612_p2)
}
   0xc   :  { %s616_s20 = scalar_lea.vmem %s39_s10, 128  ;;  %p621_p4 = scmp.lt.s32.totalorder %s39_s10, %s39_s10 }
   0xd   :  { %p617_p3 = scmp.ne.s32.totalorder %s39_s10, %s616_s20  ;;  %p622_p5 = scmp.lt.s32.totalorder %s616_s20, %s616_s20 }
   0xf   :  { %p623_p6 = por %p622_p5, %p621_p4 }
  0x11   :  { %p624_p7 = pnand %p623_p6, %p617_p3 }
  0x13   :  { %627 = shalt.err (!%p624_p7)
}
  0x14   :  { %41 = dma.hbm_to_vmem [thread:$0]  %s925_s2, 128, %s39_s10, [#allocation6]  }
  0x15   :  { %s628_s25 = scalar_lea.hbm %s923_s0, 32 }
  0x16   :  { %p629_p8 = scmp.ne.s32.totalorder %s923_s0, %s628_s25  ;;  %p632_p9 = scmp.lt.u32.totalorder %s628_s25, %s923_s0 }
  0x18   :  { %p634_p10 = pnand %p632_p9, %p629_p8 }
  0x1a   :  { %637 = shalt.err (!%p634_p10)
}
  0x1b   :  { %s638_s30 = scalar_lea.vmem %s27_s12, 32  ;;  %p643_p12 = scmp.lt.s32.totalorder %s27_s12, %s27_s12 }
  0x1c   :  { %p639_p11 = scmp.ne.s32.totalorder %s27_s12, %s638_s30  ;;  %p644_p13 = scmp.lt.s32.totalorder %s638_s30, %s638_s30 }
  0x1e   :  { %p645_p0 = por %p644_p13, %p643_p12 }
  0x20   :  { %p646_p1 = pnand %p645_p0, %p639_p11 }
  0x22   :  { %649 = shalt.err (!%p646_p1)
}
  0x23   :  { %29 = dma.hbm_to_vmem [thread:$0]  %s923_s0, 32, %s27_s12, [#allocation3]  }
  0x24   :  { %s750_s11 = smov [#allocation7]   ;;  %s650_s16 = scalar_lea.hbm %s926_s3, 1664 }
  0x25   :  { %s47_s13 = sshll.u32 %s750_s11, 4  ;;  %p651_p2 = scmp.ne.s32.totalorder %s926_s3, %s650_s16  ;;  %s48_s13 = int_to_ptr.vmem [resolvable:$true] %s47_s13 }
  0x26   :  { %p654_p3 = scmp.lt.u32.totalorder %s650_s16, %s926_s3 }
  0x28   :  { %p656_p4 = pnand %p654_p3, %p651_p2 }
  0x2a   :  { %659 = shalt.err (!%p656_p4)
}
  0x2b   :  { %s660_s21 = scalar_lea.vmem %s48_s13, 1664  ;;  %p665_p6 = scmp.lt.s32.totalorder %s48_s13, %s48_s13 }
  0x2c   :  { %p661_p5 = scmp.ne.s32.totalorder %s48_s13, %s660_s21  ;;  %p666_p7 = scmp.lt.s32.totalorder %s660_s21, %s660_s21 }
  0x2e   :  { %p667_p8 = por %p666_p7, %p665_p6 }
  0x30   :  { %p668_p9 = pnand %p667_p8, %p661_p5 }
  0x32   :  { %671 = shalt.err (!%p668_p9)
}
  0x33   :  { %s751_s0 = smov 128   ;;  %s752_s12 = smov 8  }
  0x34   :  { %53 = dma.hbm_to_vmem [thread:$0]  %s926_s3, 1664, %s48_s13, [#allocation6], %s751_s0, %s751_s0, %s752_s12  }
  0x35   :  { %s753_s24 = smov [#allocation8]   ;;  %s672_s28 = scalar_lea.hbm %s929_s6, 1664 }
  0x36   :  { %s63_s25 = sshll.u32 %s753_s24, 4  ;;  %p673_p10 = scmp.ne.s32.totalorder %s929_s6, %s672_s28  ;;  %s64_s25 = int_to_ptr.vmem [resolvable:$true] %s63_s25 }
  0x37   :  { %p676_p11 = scmp.lt.u32.totalorder %s672_s28, %s929_s6 }
  0x39   :  { %p678_p12 = pnand %p676_p11, %p673_p10 }
  0x3b   :  { %681 = shalt.err (!%p678_p12)
}
  0x3c   :  { %s682_s11 = scalar_lea.vmem %s64_s25, 1664  ;;  %p687_p0 = scmp.lt.s32.totalorder %s64_s25, %s64_s25 }
  0x3d   :  { %p683_p13 = scmp.ne.s32.totalorder %s64_s25, %s682_s11  ;;  %p688_p1 = scmp.lt.s32.totalorder %s682_s11, %s682_s11 }
  0x3f   :  { %p689_p2 = por %p688_p1, %p687_p0 }
  0x41   :  { %p690_p3 = pnand %p689_p2, %p683_p13 }
  0x43   :  { %693 = shalt.err (!%p690_p3)
}
  0x44   :  { %69 = dma.hbm_to_vmem [thread:$0]  %s929_s6, 1664, %s64_s25, [#allocation9], %s751_s0, %s751_s0, %s752_s12  }
  0x45   :  { %738 = dma.done.wait [#allocation3], 32  }
  0x46   :  { %739 = vsyncadd [#allocation3], 4294967264 }
  0x47   :  { %740 = dma.done.wait [#allocation6], 1792  }
  0x48   :  { %741 = vsyncadd [#allocation6], 4294965504 }
  0x49   :  { %742 = dma.done.wait [#allocation9], 1664  }
  0x4a   :  { %743 = vsyncadd [#allocation9], 4294965632  ;;  %v754_v0 = vmov 0.0|0.0   ;;  %v755_v1 = vmov 0.0   ;;  %vm756_vm0 = vmmov 0   ;;  %vm174_vm1 = vcmask 64512  }
  0x4b   :  { %559 = vmatprep.subr.bf16.mxu0 %v754_v0  ;;  %520 = vmatprep.subr.mxu1 %v755_v1  ;;  %v87_v2 = vld [vmem:[#allocation7] sm:$0xff]  ;;  %v88_v3 = vld [vmem:[#allocation7 + $0x8] sm:$0xff]  ;;  %v86_v4 = vld [vmem:[#allocation5] sm:$0xff]  ;;  %vm100_vm2 = vcmask 850944   ;;  %s757_s17 = smov [#allocation10]   ;;  %s758_s21 = smov [#allocation11]  }
  0x4c   :  { %522 = vmatprep.mubr.msk.f32.mxu1 %vm756_vm0, %v755_v1  ;;  %517 = vmatprep.mubr.msk.f32.mxu0 %vm756_vm0, %v755_v1  ;;  %v560_v5 = vpack.c.bf16 %v88_v3, %v87_v2  ;;  %v89_v6 = vld [vmem:[#allocation7 + $0x10] sm:$0xff]  ;;  %v90_v7 = vld [vmem:[#allocation7 + $0x18] sm:$0xff]  ;;  %v259_v9 = vld [vmem:[#allocation8] sm:$0xff]  ;;  %s428_s18 = sshll.u32 %s757_s17, 4  ;;  %s438_s0 = sshll.u32 %s758_s21, 4  ;;  %s429_s18 = int_to_ptr.vmem [resolvable:$true] %s428_s18  ;;  %s439_s0 = int_to_ptr.vmem [resolvable:$true] %s438_s0 }
  0x4d   :  { %521 = vmatpush3.msra.mxu1 %v86_v4  ;;  %v863_v8 = vld [vmem:[#allocation2] sm:$0x3]  ;;  %v563_v11 = vpack.c.bf16 %v90_v7, %v89_v6  ;;  %v261_v13 = vld [vmem:[#allocation8 + $0x10] sm:$0xff]  ;;  %v262_v14 = vld [vmem:[#allocation8 + $0x18] sm:$0xff]  ;;  %p699_p5 = scmp.lt.s32.totalorder %s429_s18, %s429_s18 }
  0x4e   :  { %577 = vmatprep.subr.bf16.mxu1 %v754_v0  ;;  %523 = vmatmul.mubr.msk.f32.vlgmr.msra.gmra.mrb[0].mxu1 %vm174_vm1, %v863_v8  ;;  %v260_v10 = vld [vmem:[#allocation8 + $0x8] sm:$0xff]  ;;  %v91_v15 = vld [vmem:[#allocation7 + $0x20] sm:$0xff]  ;;  %v92_v16 = vld [vmem:[#allocation7 + $0x28] sm:$0xff]  ;;  %v581_v17 = vpack.c.bf16 %v262_v14, %v261_v13 }
  0x4f   :  { %561 = vmatpush3.bf16.msra.mxu0 %v560_v5  ;;  %v578_v12 = vpack.c.bf16 %v260_v10, %v259_v9  ;;  %551 = vmatprep.mubr.msk.f32.mxu1 %vm756_vm0, %v755_v1  ;;  %v263_v18 = vld [vmem:[#allocation8 + $0x20] sm:$0xff]  ;;  %v264_v19 = vld [vmem:[#allocation8 + $0x28] sm:$0xff]  ;;  %v566_v20 = vpack.c.bf16 %v92_v16, %v91_v15  ;;  %v94_v22 = vld [vmem:[#allocation7 + $0x38] sm:$0xff] }
  0x50   :  { %562 = vmatprep.subr.bf16.mxu0 %v754_v0  ;;  %v93_v21 = vld [vmem:[#allocation7 + $0x30] sm:$0xff]  ;;  %v584_v23 = vpack.c.bf16 %v264_v19, %v263_v18  ;;  %v265_v24 = vld [vmem:[#allocation8 + $0x30] sm:$0xff]  ;;  %v266_v25 = vld [vmem:[#allocation8 + $0x38] sm:$0xff] }
  0x51   :  { %579 = vmatpush3.bf16.msra.mxu1 %v578_v12  ;;  %v569_v26 = vpack.c.bf16 %v94_v22, %v93_v21  ;;  %v95_v27 = vld [vmem:[#allocation7 + $0x40] sm:$0xff]  ;;  %v96_v28 = vld [vmem:[#allocation7 + $0x48] sm:$0xff]  ;;  %v587_v29 = vpack.c.bf16 %v266_v25, %v265_v24  ;;  %v268_v31 = vld [vmem:[#allocation8 + $0x48] sm:$0xff] }
  0x52   :  { %580 = vmatprep.subr.bf16.mxu1 %v754_v0  ;;  %v267_v30 = vld [vmem:[#allocation8 + $0x40] sm:$0xff]  ;;  %v572_v32 = vpack.c.bf16 %v96_v28, %v95_v27  ;;  %v97_v33 = vld [vmem:[#allocation7 + $0x50] sm:$0xff]  ;;  %v98_v34 = vld [vmem:[#allocation7 + $0x58] sm:$0xff] }
  0x53   :  { %564 = vmatpush3.bf16.msra.mxu0 %v563_v11  ;;  %v590_v35 = vpack.c.bf16 %v268_v31, %v267_v30  ;;  %v269_v36 = vld [vmem:[#allocation8 + $0x50] sm:$0xff]  ;;  %v270_v37 = vld [vmem:[#allocation8 + $0x58] sm:$0xff]  ;;  %v575_v38 = vpack.c.bf16 %v98_v34, %v97_v33  ;;  %v85_v41 = vld [vmem:[%s924_s1] sm:$0x3] }
  0x54   :  { %565 = vmatprep.subr.bf16.mxu0 %v754_v0  ;;  %v593_v39 = vpack.c.bf16 %v270_v37, %v269_v36  ;;  %v99_v40 = vld [vmem:[#allocation7 + $0x60] sm:$0xff]  ;;  %v258_v42 = vld [vmem:[%s928_s5] sm:$0xff] }
  0x55   :  { %582 = vmatpush3.bf16.msra.mxu1 %v581_v17  ;;  %v271_v43 = vld [vmem:[#allocation8 + $0x60] sm:$0xff] }
  0x56   :  { %583 = vmatprep.subr.bf16.mxu1 %v754_v0  ;;  %v455_v47 = vld [vmem:[%s927_s4] ss:$0 sm:$0xff]  ;;  %s694_s4 = scalar_lea.vmem %s429_s18, 32 }
  0x57   :  { %567 = vmatpush3.bf16.msra.mxu0 %v566_v20  ;;  %v458_v54 = vld [vmem:[%s930_s7] ss:$0 sm:$0xff]  ;;  %p695_p4 = scmp.ne.s32.totalorder %s429_s18, %s694_s4  ;;  %p700_p6 = scmp.lt.s32.totalorder %s694_s4, %s694_s4 }
  0x58   :  { %568 = vmatprep.subr.bf16.mxu0 %v754_v0 }
  0x59   :  { %585 = vmatpush3.bf16.msra.mxu1 %v584_v23  ;;  %p701_p7 = por %p700_p6, %p699_p5 }
  0x5a   :  { %586 = vmatprep.subr.bf16.mxu1 %v754_v0 }
  0x5b   :  { %570 = vmatpush3.bf16.msra.mxu0 %v569_v26  ;;  %p702_p8 = pnand %p701_p7, %p695_p4 }
  0x5c   :  { %571 = vmatprep.subr.bf16.mxu0 %v754_v0 }
  0x5d   :  { %588 = vmatpush3.bf16.msra.mxu1 %v587_v29 }
  0x5e   :  { %589 = vmatprep.subr.bf16.mxu1 %v754_v0 }
  0x5f   :  { %573 = vmatpush3.bf16.msra.mxu0 %v572_v32 }
  0x60   :  { %574 = vmatprep.subr.bf16.mxu0 %v754_v0 }
  0x61   :  { %591 = vmatpush3.bf16.msra.mxu1 %v590_v35 }
  0x62   :  { %592 = vmatprep.subr.bf16.mxu1 %v754_v0 }
  0x63   :  { %576 = vmatpush3.bf16.msra.mxu0 %v575_v38 }
  0x64   :  { %515 = vmatprep.subr.mxu0 %v755_v1 }
  0x65   :  { %594 = vmatpush3.bf16.msra.mxu1 %v593_v39 }
  0x66   :  { %549 = vmatprep.subr.mxu1 %v755_v1 }
  0x67   :  { %516 = vmatpush3.msra.mxu0 %v99_v40 }
  0x68   :  { %518 = vmatmul.mubr.msk.f32.vlgmr.msra.gmra.mrb[0].mxu0 %vm100_vm2, %v85_v41  ;;  %554 = vmatprep.subr.mxu0 %v755_v1 }
  0x69   :  { %555 = vmatpush3.msra.mxu0 %v258_v42  ;;  %550 = vmatpush3.msra.mxu1 %v271_v43 }
  0x6a   :  { %556 = vmatprep.mubr.msk.f32.mxu0 %vm756_vm0, %v755_v1  ;;  %552 = vmatmul.mubr.msk.f32.vlgmr.msra.gmra.mrb[2].mxu1 %vm100_vm2, %v85_v41 }
  0x6c   :  { %557 = vmatmul.mubr.msk.f32.vlgmr.msra.gmra.mrb[2].mxu0 %vm174_vm1, %v863_v8 }
 0x121   :  { %v244_v44 = vpop.f32.mrb[0].mxu1 }
 0x122   :  { %v524_v45 = vpop.f32.mrb[1].mxu1 }
 0x13b   :  { %v170_v46 = vpop.f32.mrb[0].mxu0 }
 0x13c   :  { %v245_v48 = vadd.f32 %v244_v44, %v170_v46  ;;  %v519_v49 = vpop.f32.mrb[1].mxu0 }
 0x13d   :  { %v338_v50 = vpop.f32.mrb[2].mxu1 }
 0x13e   :  { %v255_v51 = vadd.f32 %v455_v47, %v245_v48  ;;  %v553_v52 = vpop.f32.mrb[3].mxu1 }
 0x13f   :  { %v408_v53 = vpop.f32.mrb[2].mxu0 }
 0x140   :  { %v256_v55 = vmax.f32 %v255_v51, 0.0  ;;  %v409_v56 = vadd.f32 %v408_v53, %v338_v50  ;;  %v558_v57 = vpop.f32.mrb[3].mxu0 }
 0x142   :  { %257 = vst [vmem:[#allocation10] sm:$0x3] %v256_v55  ;;  %v419_v58 = vadd.f32 %v458_v54, %v409_v56 }
 0x143   :  { %705 = shalt.err (!%p702_p8)
}
 0x144   :  { %s706_s23 = scalar_lea.hbm %s931_s8, 32 }
 0x145   :  { %p707_p9 = scmp.ne.s32.totalorder %s931_s8, %s706_s23  ;;  %p710_p10 = scmp.lt.u32.totalorder %s706_s23, %s931_s8 }
 0x147   :  { %p712_p11 = pnand %p710_p10, %p707_p9 }
 0x149   :  { %715 = shalt.err (!%p712_p11)
}
 0x14a   :  { %431 = dma.vmem_to_hbm [thread:$0]  %s429_s18, 32, %s931_s8, [#allocation4]   ;;  %v420_v59 = vmax.f32 %v419_v58, 0.0 }
 0x14b   :  { %s716_s29 = scalar_lea.vmem %s439_s0, 32  ;;  %p721_p13 = scmp.lt.s32.totalorder %s439_s0, %s439_s0 }
 0x14c   :  { %421 = vst [vmem:[#allocation11] sm:$0x3] %v420_v59  ;;  %p717_p12 = scmp.ne.s32.totalorder %s439_s0, %s716_s29  ;;  %p722_p0 = scmp.lt.s32.totalorder %s716_s29, %s716_s29 }
 0x14e   :  { %p723_p1 = por %p722_p0, %p721_p13 }
 0x150   :  { %p724_p2 = pnand %p723_p1, %p717_p12 }
 0x152   :  { %727 = shalt.err (!%p724_p2)
}
 0x153   :  { %s728_s10 = scalar_lea.hbm %s932_s9, 32 }
 0x154   :  { %p729_p3 = scmp.ne.s32.totalorder %s932_s9, %s728_s10  ;;  %p732_p4 = scmp.lt.u32.totalorder %s728_s10, %s932_s9 }
 0x156   :  { %p734_p5 = pnand %p732_p4, %p729_p3 }
 0x158   :  { %737 = shalt.err (!%p734_p5)
}
 0x159   :  { %441 = dma.vmem_to_hbm [thread:$0]  %s439_s0, 32, %s932_s9, [#allocation12]  }
 0x15a   :  { %744 = dma.done.wait [#allocation4], 32  }
 0x15b   :  { %745 = vsyncadd [#allocation4], 4294967264 }
 0x15c   :  { %746 = dma.done.wait [#allocation12], 32  }
 0x15d   :  { %747 = vsyncadd [#allocation12], 4294967264 }
 0x15e   :  { %448 = vsyncpa [#allocation3], 1 }
 0x15f   :  { %449 = vsyncpa [#allocation6], 1 }
 0x160   :  { %450 = vsyncpa [#allocation9], 1 }
 0x161   :  { %451 = vsyncpa [#allocation4], 1 }
 0x162   :  { %452 = vsyncpa [#allocation12], 1 }

</bundles_post_ra>
